<compile_context>
chip_gen: v5e
topology: v5e:2x2
jax: 0.10.0
libtpu: 0.0.40
codegen_flags: <defaults>
</compile_context>

<pallas_src>
import math

import jax
import jax.numpy as jnp
from jax import lax
from jax.experimental import pallas as pl
from jax.experimental.pallas import tpu as pltpu

_INV_SQRT2 = 1.0 / math.sqrt(2.0)


def _round_up(v, m):
    return (v + m - 1) // m * m


def _mrm_kernel(x_ref, w1_ref, b1_ref, g_ref, be_ref, w2_ref, b2_ref,
                o_ref, h_ref):
    j = pl.program_id(1)

    @pl.when(j == 0)
    def _():
        # --- Linear(hidden, hidden): MXU matmul in compute dtype, f32 accum ---
        h = jnp.dot(x_ref[...], w1_ref[...], preferred_element_type=jnp.float32)
        h = h + b1_ref[...]
        # --- exact erf-based GELU (UNITER GELU), f32 ---
        h = 0.5 * h * (1.0 + lax.erf(h * jnp.float32(_INV_SQRT2)))
        # --- LayerNorm(hidden, eps=1e-12) over last dim, f32 ---
        mu = jnp.mean(h, axis=-1, keepdims=True)
        var = jnp.mean(jnp.square(h - mu), axis=-1, keepdims=True)
        hn = (h - mu) * lax.rsqrt(var + jnp.float32(1e-12))
        hn = hn * g_ref[...] + be_ref[...]
        # Stash in compute dtype so the second dot feeds the native MXU path.
        h_ref[...] = hn.astype(h_ref.dtype)

    # --- F.linear(hidden, img_linear_weight.t(), bias) == hidden @ W_img + b ---
    out = jnp.dot(h_ref[...], w2_ref[...], preferred_element_type=jnp.float32)
    out = out + b2_ref[...]
    o_ref[...] = out.astype(o_ref.dtype)


def region_feature_regression(x, w1, b1, gamma, beta, img_linear_weight, bias,
                              *, block_rows=None, block_cols=None,
                              compute_dtype=None):
    """x: [B, H]; w1: [H, H] torch layout ([out, in]); img_linear_weight: [H, F]."""
    B, H = x.shape
    F_DIM = img_linear_weight.shape[1]
    out_dtype = x.dtype
    cdt = jnp.dtype(compute_dtype) if compute_dtype is not None else jnp.dtype(x.dtype)

    # Sublane alignment: 8 rows for 4-byte dtypes, 16 for 2-byte (bf16).
    row_align = 8 * max(1, 4 // cdt.itemsize)

    if block_rows is None:
        block_rows = min(512, _round_up(B, row_align))
    block_rows = max(row_align, _round_up(block_rows, row_align))
    block_rows = min(block_rows, _round_up(B, row_align))
    B_pad = _round_up(B, block_rows)

    if block_cols is None:
        block_cols = min(1024, _round_up(F_DIM, 128))
    block_cols = max(128, _round_up(block_cols, 128))
    block_cols = min(block_cols, _round_up(F_DIM, 128))
    F_pad = _round_up(F_DIM, block_cols)

    # ---- operand prep (pre-transpose W1, pad batch rows / feature cols) ----
    x_c = x.astype(cdt)
    if B_pad != B:
        x_c = jnp.pad(x_c, ((0, B_pad - B), (0, 0)))
    w1_t = jnp.asarray(w1).T.astype(cdt)                   # [H, H] so kernel does x @ W1^T
    w2_c = jnp.asarray(img_linear_weight).astype(cdt)      # [H, F]
    b2_c = jnp.asarray(bias).astype(jnp.float32)
    if F_pad != F_DIM:
        w2_c = jnp.pad(w2_c, ((0, 0), (0, F_pad - F_DIM)))
        b2_c = jnp.pad(b2_c, ((0, F_pad - F_DIM),))
    b1_2d = jnp.asarray(b1).reshape(1, H).astype(jnp.float32)
    g_2d = jnp.asarray(gamma).reshape(1, H).astype(jnp.float32)
    be_2d = jnp.asarray(beta).reshape(1, H).astype(jnp.float32)
    b2_2d = b2_c.reshape(1, F_pad)

    grid = (B_pad // block_rows, F_pad // block_cols)

    # ---- VMEM budget (layout-padded) and cost estimate ----
    def tile_bytes(r, c, dt):
        it = jnp.dtype(dt).itemsize
        sub = 8 * max(1, 4 // it)
        return _round_up(max(r, 1), sub) * _round_up(max(c, 1), 128) * it

    weight_bytes = tile_bytes(H, H, cdt) + 3 * tile_bytes(1, H, jnp.float32)
    est = (2 * tile_bytes(block_rows, H, cdt)                         # x (dbl buf)
           + 2 * tile_bytes(block_rows, block_cols, out_dtype)        # out (dbl buf)
           + 2 * (tile_bytes(H, block_cols, cdt)
                  + tile_bytes(1, block_cols, jnp.float32))           # W2/b2 col tiles
           + weight_bytes                                             # W1/b1/gamma/beta
           + tile_bytes(block_rows, H, cdt))                          # hidden scratch
    vmem_limit = int(min(max(2 * est + (4 << 20), 32 << 20), 64 << 20))

    cost = pl.CostEstimate(
        flops=2 * B_pad * H * H + 2 * B_pad * H * F_pad,
        transcendentals=B_pad * H,
        bytes_accessed=int(x_c.size * x_c.dtype.itemsize
                           + w1_t.size * w1_t.dtype.itemsize
                           + w2_c.size * w2_c.dtype.itemsize
                           + B_pad * F_pad * jnp.dtype(out_dtype).itemsize),
    )

    def build(single_buffer_weights):
        if single_buffer_weights:
            def const_spec(shape):
                return pl.BlockSpec(shape, lambda i, j: (0, 0),
                                    pipeline_mode=pl.Buffered(1))
        else:
            def const_spec(shape):
                return pl.BlockSpec(shape, lambda i, j: (0, 0))

        in_specs = [
            pl.BlockSpec((block_rows, H), lambda i, j: (i, 0)),    # x batch tile
            const_spec((H, H)),                                    # W1^T (resident)
            const_spec((1, H)),                                    # b1
            const_spec((1, H)),                                    # LN gamma
            const_spec((1, H)),                                    # LN beta
            pl.BlockSpec((H, block_cols), lambda i, j: (0, j)),    # W2 column tile
            pl.BlockSpec((1, block_cols), lambda i, j: (0, j)),    # output bias tile
        ]
        return pl.pallas_call(
            _mrm_kernel,
            out_shape=jax.ShapeDtypeStruct((B_pad, F_pad), out_dtype),
            grid=grid,
            in_specs=in_specs,
            out_specs=pl.BlockSpec((block_rows, block_cols), lambda i, j: (i, j)),
            scratch_shapes=[pltpu.VMEM((block_rows, H), cdt)],     # hidden (post-LN)
            compiler_params=pltpu.CompilerParams(
                dimension_semantics=("parallel", "arbitrary"),
                vmem_limit_bytes=vmem_limit),
            cost_estimate=cost,
        )

    args = (x_c, w1_t, b1_2d, g_2d, be_2d, w2_c, b2_2d)
    try:
        out = build(True)(*args)
    except Exception:
        # Fallback if this JAX build rejects pipeline_mode=pl.Buffered(1):
        # identical math, default (double) buffering for the weight blocks.
        out = build(False)(*args)

    if B_pad != B or F_pad != F_DIM:
        out = out[:B, :F_DIM]
    return out


def _reference(x, w1, b1, gamma, beta, img_linear_weight, bias):
    x = x.astype(jnp.float32)
    h = x @ w1.T + b1
    h = 0.5 * h * (1.0 + lax.erf(h * jnp.float32(_INV_SQRT2)))
    mu = jnp.mean(h, axis=-1, keepdims=True)
    var = jnp.mean((h - mu) ** 2, axis=-1, keepdims=True)
    hn = (h - mu) / jnp.sqrt(var + 1e-12) * gamma + beta
    return hn @ img_linear_weight + bias


if __name__ == "__main__":
    master = jax.random.PRNGKey(0)

    def run_case(B, HIDDEN, FEAT, key, **kwargs):
        ks = jax.random.split(key, 7)
        x = jax.random.normal(ks[0], (B, HIDDEN), dtype=jnp.float32)
        w1 = jax.random.normal(ks[1], (HIDDEN, HIDDEN), dtype=jnp.float32) * 0.05
        b1 = jax.random.normal(ks[2], (HIDDEN,), dtype=jnp.float32) * 0.01
        gamma = 1.0 + 0.1 * jax.random.normal(ks[3], (HIDDEN,), dtype=jnp.float32)
        beta = 0.1 * jax.random.normal(ks[4], (HIDDEN,), dtype=jnp.float32)
        w_img = jax.random.normal(ks[5], (HIDDEN, FEAT), dtype=jnp.float32) * 0.05
        bias = 0.1 * jax.random.normal(ks[6], (FEAT,), dtype=jnp.float32)
        out = region_feature_regression(x, w1, b1, gamma, beta, w_img, bias, **kwargs)
        out = jax.block_until_ready(out)
        ref = _reference(x, w1, b1, gamma, beta, w_img, bias)
        assert out.shape == (B, FEAT)
        return out, ref

    k1, k2, k3 = jax.random.split(master, 3)

    # 1) Tiny, lane-unaligned shapes (exercises the pad-to-128 / slice path), f32.
    out, ref = run_case(8, 32, 16, k1)
    assert jnp.allclose(out, ref, atol=1e-4, rtol=1e-4), "tiny f32 case mismatch"

    # 2) Aligned shapes with a multi-step (4 x 2) grid + hidden-scratch reuse, f32.
    out, ref = run_case(64, 128, 256, k2, block_rows=16, block_cols=128)
    assert jnp.allclose(out, ref, atol=1e-3, rtol=1e-3), "tiled f32 case mismatch"

    # 3) Same shapes, bf16 MXU operands with f32 accumulation (native MXU path).
    out, ref = run_case(64, 128, 256, k3, block_rows=16, block_cols=128,
                        compute_dtype=jnp.bfloat16)
    rel = jnp.linalg.norm(out.astype(jnp.float32) - ref) / jnp.linalg.norm(ref)
    assert float(rel) < 5e-2, f"bf16 case relative error too high: {float(rel)}"

    print("KERNEL_OK")
</pallas_src>

<mosaic_0001>
module attributes {stable_mosaic.version = 11 : i64} {
  func.func @_mrm_kernel(%arg0: i32, %arg1: i32, %arg2: memref<8x32xf32, #tpu.memory_space<vmem>>, %arg3: memref<32x32xf32, #tpu.memory_space<vmem>>, %arg4: memref<1x32xf32, #tpu.memory_space<vmem>>, %arg5: memref<1x32xf32, #tpu.memory_space<vmem>>, %arg6: memref<1x32xf32, #tpu.memory_space<vmem>>, %arg7: memref<32x128xf32, #tpu.memory_space<vmem>>, %arg8: memref<1x128xf32, #tpu.memory_space<vmem>>, %arg9: memref<8x128xf32, #tpu.memory_space<vmem>>, %arg10: memref<8x32xf32, #tpu.memory_space<vmem>>) attributes {dimension_semantics = [#tpu.dimension_semantics<parallel>, #tpu.dimension_semantics<arbitrary>], iteration_bounds = array<i64: 1, 1>, scalar_prefetch = 0 : i64, scratch_operands = 1 : i64, tpu.core_type = #tpu.core_type<tc>, window_params = [{transform_indices = @transform_0, window_bounds = array<i64: 8, 32>}, {pipeline_mode = #tpu.pipeline_mode<synchronous>, transform_indices = @transform_1, window_bounds = array<i64: 32, 32>}, {pipeline_mode = #tpu.pipeline_mode<synchronous>, transform_indices = @transform_2, window_bounds = array<i64: 1, 32>}, {pipeline_mode = #tpu.pipeline_mode<synchronous>, transform_indices = @transform_3, window_bounds = array<i64: 1, 32>}, {pipeline_mode = #tpu.pipeline_mode<synchronous>, transform_indices = @transform_4, window_bounds = array<i64: 1, 32>}, {transform_indices = @transform_5, window_bounds = array<i64: 32, 128>}, {transform_indices = @transform_6, window_bounds = array<i64: 1, 128>}, {transform_indices = @transform_7, window_bounds = array<i64: 8, 128>}]} {
    %c0_i32 = arith.constant 0 : i32
    %0 = arith.cmpi eq, %arg1, %c0_i32 : i32
    %1 = arith.extui %0 : i1 to i32
    %c0_i32_0 = arith.constant 0 : i32
    %2 = arith.cmpi ne, %1, %c0_i32_0 : i32
    scf.if %2 {
      %c0_8 = arith.constant 0 : index
      %c0_9 = arith.constant 0 : index
      %10 = vector.load %arg2[%c0_8, %c0_9] : memref<8x32xf32, #tpu.memory_space<vmem>>, vector<8x32xf32>
      %c0_10 = arith.constant 0 : index
      %c0_11 = arith.constant 0 : index
      %11 = vector.load %arg3[%c0_10, %c0_11] : memref<32x32xf32, #tpu.memory_space<vmem>>, vector<32x32xf32>
      %cst_12 = arith.constant dense<0.000000e+00> : vector<8x32xf32>
      %12 = tpu.matmul %10, %11, %cst_12 {dimension_numbers = #tpu.dot_dimension_numbers<[1], [0], [0], [1], [0, 0, 1, 1], [], []>} : vector<8x32xf32>, vector<32x32xf32>, vector<8x32xf32> -> vector<8x32xf32>
      %c0_13 = arith.constant 0 : index
      %c0_14 = arith.constant 0 : index
      %13 = vector.load %arg4[%c0_13, %c0_14] : memref<1x32xf32, #tpu.memory_space<vmem>>, vector<1x32xf32>
      %14 = vector.broadcast %13 : vector<1x32xf32> to vector<8x32xf32>
      %15 = arith.addf %12, %14 : vector<8x32xf32>
      %cst_15 = arith.constant 5.000000e-01 : f32
      %16 = vector.broadcast %cst_15 : f32 to vector<8x32xf32>
      %17 = arith.mulf %16, %15 : vector<8x32xf32>
      %cst_16 = arith.constant 0.707106769 : f32
      %18 = vector.broadcast %cst_16 : f32 to vector<8x32xf32>
      %19 = arith.mulf %15, %18 : vector<8x32xf32>
      %20 = math.erf %19 : vector<8x32xf32>
      %cst_17 = arith.constant 1.000000e+00 : f32
      %21 = vector.broadcast %cst_17 : f32 to vector<8x32xf32>
      %22 = arith.addf %21, %20 : vector<8x32xf32>
      %23 = arith.mulf %17, %22 : vector<8x32xf32>
      %cst_18 = arith.constant dense<0.000000e+00> : vector<8xf32>
      %24 = vector.multi_reduction <add>, %23, %cst_18 [1] : vector<8x32xf32> to vector<8xf32>
      %25 = vector.shape_cast %24 : vector<8xf32> to vector<8x1xf32>
      %cst_19 = arith.constant 3.200000e+01 : f32
      %26 = vector.broadcast %cst_19 : f32 to vector<8x1xf32>
      %27 = arith.divf %25, %26 : vector<8x1xf32>
      %28 = vector.broadcast %27 : vector<8x1xf32> to vector<8x32xf32>
      %29 = arith.subf %23, %28 : vector<8x32xf32>
      %30 = arith.mulf %29, %29 : vector<8x32xf32>
      %cst_20 = arith.constant dense<0.000000e+00> : vector<8xf32>
      %31 = vector.multi_reduction <add>, %30, %cst_20 [1] : vector<8x32xf32> to vector<8xf32>
      %32 = vector.shape_cast %31 : vector<8xf32> to vector<8x1xf32>
      %cst_21 = arith.constant 3.200000e+01 : f32
      %33 = vector.broadcast %cst_21 : f32 to vector<8x1xf32>
      %34 = arith.divf %32, %33 : vector<8x1xf32>
      %35 = vector.broadcast %27 : vector<8x1xf32> to vector<8x32xf32>
      %36 = arith.subf %23, %35 : vector<8x32xf32>
      %cst_22 = arith.constant 9.99999996E-13 : f32
      %37 = vector.broadcast %cst_22 : f32 to vector<8x1xf32>
      %38 = arith.addf %34, %37 : vector<8x1xf32>
      %39 = math.rsqrt %38 : vector<8x1xf32>
      %40 = vector.broadcast %39 : vector<8x1xf32> to vector<8x32xf32>
      %41 = arith.mulf %36, %40 : vector<8x32xf32>
      %c0_23 = arith.constant 0 : index
      %c0_24 = arith.constant 0 : index
      %42 = vector.load %arg5[%c0_23, %c0_24] : memref<1x32xf32, #tpu.memory_space<vmem>>, vector<1x32xf32>
      %43 = vector.broadcast %42 : vector<1x32xf32> to vector<8x32xf32>
      %44 = arith.mulf %41, %43 : vector<8x32xf32>
      %c0_25 = arith.constant 0 : index
      %c0_26 = arith.constant 0 : index
      %45 = vector.load %arg6[%c0_25, %c0_26] : memref<1x32xf32, #tpu.memory_space<vmem>>, vector<1x32xf32>
      %46 = vector.broadcast %45 : vector<1x32xf32> to vector<8x32xf32>
      %47 = arith.addf %44, %46 : vector<8x32xf32>
      %c0_27 = arith.constant 0 : index
      %c0_28 = arith.constant 0 : index
      %48 = vector.load %arg10[%c0_27, %c0_28] : memref<8x32xf32, #tpu.memory_space<vmem>>, vector<8x32xf32>
      tpu.vector_store %arg10[%c0_27, %c0_28], %47 {strides = array<i32>} : memref<8x32xf32, #tpu.memory_space<vmem>>, vector<8x32xf32>,
    } else {
    }
    %c0 = arith.constant 0 : index
    %c0_1 = arith.constant 0 : index
    %3 = vector.load %arg10[%c0, %c0_1] : memref<8x32xf32, #tpu.memory_space<vmem>>, vector<8x32xf32>
    %c0_2 = arith.constant 0 : index
    %c0_3 = arith.constant 0 : index
    %4 = vector.load %arg7[%c0_2, %c0_3] : memref<32x128xf32, #tpu.memory_space<vmem>>, vector<32x128xf32>
    %cst = arith.constant dense<0.000000e+00> : vector<8x128xf32>
    %5 = tpu.matmul %3, %4, %cst {dimension_numbers = #tpu.dot_dimension_numbers<[1], [0], [0], [1], [0, 0, 1, 1], [], []>} : vector<8x32xf32>, vector<32x128xf32>, vector<8x128xf32> -> vector<8x128xf32>
    %c0_4 = arith.constant 0 : index
    %c0_5 = arith.constant 0 : index
    %6 = vector.load %arg8[%c0_4, %c0_5] : memref<1x128xf32, #tpu.memory_space<vmem>>, vector<1x128xf32>
    %7 = vector.broadcast %6 : vector<1x128xf32> to vector<8x128xf32>
    %8 = arith.addf %5, %7 : vector<8x128xf32>
    %c0_6 = arith.constant 0 : index
    %c0_7 = arith.constant 0 : index
    %9 = vector.load %arg9[%c0_6, %c0_7] : memref<8x128xf32, #tpu.memory_space<vmem>>, vector<8x128xf32>
    tpu.vector_store %arg9[%c0_6, %c0_7], %8 {strides = array<i32>} : memref<8x128xf32, #tpu.memory_space<vmem>>, vector<8x128xf32>,
    return
  }
  func.func @transform_0(%arg0: i32, %arg1: i32) -> (i32, i32) {
    %c0_i32 = arith.constant 0 : i32
    %c0_i32_0 = arith.constant 0 : i32
    return %arg0, %c0_i32 : i32, i32
  }
  func.func @transform_1(%arg0: i32, %arg1: i32) -> (i32, i32) {
    %c0_i32 = arith.constant 0 : i32
    %c0_i32_0 = arith.constant 0 : i32
    %c0_i32_1 = arith.constant 0 : i32
    return %c0_i32, %c0_i32_0 : i32, i32
  }
  func.func @transform_2(%arg0: i32, %arg1: i32) -> (i32, i32) {
    %c0_i32 = arith.constant 0 : i32
    %c0_i32_0 = arith.constant 0 : i32
    %c0_i32_1 = arith.constant 0 : i32
    return %c0_i32, %c0_i32_0 : i32, i32
  }
  func.func @transform_3(%arg0: i32, %arg1: i32) -> (i32, i32) {
    %c0_i32 = arith.constant 0 : i32
    %c0_i32_0 = arith.constant 0 : i32
    %c0_i32_1 = arith.constant 0 : i32
    return %c0_i32, %c0_i32_0 : i32, i32
  }
  func.func @transform_4(%arg0: i32, %arg1: i32) -> (i32, i32) {
    %c0_i32 = arith.constant 0 : i32
    %c0_i32_0 = arith.constant 0 : i32
    %c0_i32_1 = arith.constant 0 : i32
    return %c0_i32, %c0_i32_0 : i32, i32
  }
  func.func @transform_5(%arg0: i32, %arg1: i32) -> (i32, i32) {
    %c0_i32 = arith.constant 0 : i32
    %c0_i32_0 = arith.constant 0 : i32
    return %c0_i32, %arg1 : i32, i32
  }
  func.func @transform_6(%arg0: i32, %arg1: i32) -> (i32, i32) {
    %c0_i32 = arith.constant 0 : i32
    %c0_i32_0 = arith.constant 0 : i32
    return %c0_i32, %arg1 : i32, i32
  }
  func.func @transform_7(%arg0: i32, %arg1: i32) -> (i32, i32) {
    %c0_i32 = arith.constant 0 : i32
    return %arg0, %arg1 : i32, i32
  }
}

module attributes {stable_mosaic.version = 11 : i64} {
  func.func @_mrm_kernel(%arg0: i32, %arg1: i32, %arg2: memref<8x32xf32, #tpu.memory_space<vmem>>, %arg3: memref<32x32xf32, #tpu.memory_space<vmem>>, %arg4: memref<1x32xf32, #tpu.memory_space<vmem>>, %arg5: memref<1x32xf32, #tpu.memory_space<vmem>>, %arg6: memref<1x32xf32, #tpu.memory_space<vmem>>, %arg7: memref<32x128xf32, #tpu.memory_space<vmem>>, %arg8: memref<1x128xf32, #tpu.memory_space<vmem>>, %arg9: memref<8x128xf32, #tpu.memory_space<vmem>>, %arg10: memref<8x32xf32, #tpu.memory_space<vmem>>) attributes {dimension_semantics = [#tpu.dimension_semantics<parallel>, #tpu.dimension_semantics<arbitrary>], iteration_bounds = array<i64: 1, 1>, scalar_prefetch = 0 : i64, scratch_operands = 1 : i64, tpu.core_type = #tpu.core_type<tc>, window_params = [{transform_indices = @transform_0, window_bounds = array<i64: 8, 32>}, {pipeline_mode = #tpu.pipeline_mode<synchronous>, transform_indices = @transform_1, window_bounds = array<i64: 32, 32>}, {pipeline_mode = #tpu.pipeline_mode<synchronous>, transform_indices = @transform_2, window_bounds = array<i64: 1, 32>}, {pipeline_mode = #tpu.pipeline_mode<synchronous>, transform_indices = @transform_3, window_bounds = array<i64: 1, 32>}, {pipeline_mode = #tpu.pipeline_mode<synchronous>, transform_indices = @transform_4, window_bounds = array<i64: 1, 32>}, {transform_indices = @transform_5, window_bounds = array<i64: 32, 128>}, {transform_indices = @transform_6, window_bounds = array<i64: 1, 128>}, {transform_indices = @transform_7, window_bounds = array<i64: 8, 128>}]} {
    %c0_i32 = arith.constant 0 : i32
    %0 = arith.cmpi eq, %arg1, %c0_i32 : i32
    %1 = arith.extui %0 : i1 to i32
    %c0_i32_0 = arith.constant 0 : i32
    %2 = arith.cmpi ne, %1, %c0_i32_0 : i32
    scf.if %2 {
      %c0_8 = arith.constant 0 : index
      %c0_9 = arith.constant 0 : index
      %10 = vector.load %arg2[%c0_8, %c0_9] : memref<8x32xf32, #tpu.memory_space<vmem>>, vector<8x32xf32>
      %c0_10 = arith.constant 0 : index
      %c0_11 = arith.constant 0 : index
      %11 = vector.load %arg3[%c0_10, %c0_11] : memref<32x32xf32, #tpu.memory_space<vmem>>, vector<32x32xf32>
      %cst_12 = arith.constant dense<0.000000e+00> : vector<8x32xf32>
      %12 = tpu.matmul %10, %11, %cst_12 {dimension_numbers = #tpu.dot_dimension_numbers<[1], [0], [0], [1], [0, 0, 1, 1], [], []>} : vector<8x32xf32>, vector<32x32xf32>, vector<8x32xf32> -> vector<8x32xf32>
      %c0_13 = arith.constant 0 : index
      %c0_14 = arith.constant 0 : index
      %13 = vector.load %arg4[%c0_13, %c0_14] : memref<1x32xf32, #tpu.memory_space<vmem>>, vector<1x32xf32>
      %14 = vector.broadcast %13 : vector<1x32xf32> to vector<8x32xf32>
      %15 = arith.addf %12, %14 : vector<8x32xf32>
      %cst_15 = arith.constant 5.000000e-01 : f32
      %16 = vector.broadcast %cst_15 : f32 to vector<8x32xf32>
      %17 = arith.mulf %16, %15 : vector<8x32xf32>
      %cst_16 = arith.constant 0.707106769 : f32
      %18 = vector.broadcast %cst_16 : f32 to vector<8x32xf32>
      %19 = arith.mulf %15, %18 : vector<8x32xf32>
      %20 = math.erf %19 : vector<8x32xf32>
      %cst_17 = arith.constant 1.000000e+00 : f32
      %21 = vector.broadcast %cst_17 : f32 to vector<8x32xf32>
      %22 = arith.addf %21, %20 : vector<8x32xf32>
      %23 = arith.mulf %17, %22 : vector<8x32xf32>
      %cst_18 = arith.constant dense<0.000000e+00> : vector<8xf32>
      %24 = vector.multi_reduction <add>, %23, %cst_18 [1] : vector<8x32xf32> to vector<8xf32>
      %25 = vector.shape_cast %24 : vector<8xf32> to vector<8x1xf32>
      %cst_19 = arith.constant 3.200000e+01 : f32
      %26 = vector.broadcast %cst_19 : f32 to vector<8x1xf32>
      %27 = arith.divf %25, %26 : vector<8x1xf32>
      %28 = vector.broadcast %27 : vector<8x1xf32> to vector<8x32xf32>
      %29 = arith.subf %23, %28 : vector<8x32xf32>
      %30 = arith.mulf %29, %29 : vector<8x32xf32>
      %cst_20 = arith.constant dense<0.000000e+00> : vector<8xf32>
      %31 = vector.multi_reduction <add>, %30, %cst_20 [1] : vector<8x32xf32> to vector<8xf32>
      %32 = vector.shape_cast %31 : vector<8xf32> to vector<8x1xf32>
      %cst_21 = arith.constant 3.200000e+01 : f32
      %33 = vector.broadcast %cst_21 : f32 to vector<8x1xf32>
      %34 = arith.divf %32, %33 : vector<8x1xf32>
      %35 = vector.broadcast %27 : vector<8x1xf32> to vector<8x32xf32>
      %36 = arith.subf %23, %35 : vector<8x32xf32>
      %cst_22 = arith.constant 9.99999996E-13 : f32
      %37 = vector.broadcast %cst_22 : f32 to vector<8x1xf32>
      %38 = arith.addf %34, %37 : vector<8x1xf32>
      %39 = math.rsqrt %38 : vector<8x1xf32>
      %40 = vector.broadcast %39 : vector<8x1xf32> to vector<8x32xf32>
      %41 = arith.mulf %36, %40 : vector<8x32xf32>
      %c0_23 = arith.constant 0 : index
      %c0_24 = arith.constant 0 : index
      %42 = vector.load %arg5[%c0_23, %c0_24] : memref<1x32xf32, #tpu.memory_space<vmem>>, vector<1x32xf32>
      %43 = vector.broadcast %42 : vector<1x32xf32> to vector<8x32xf32>
      %44 = arith.mulf %41, %43 : vector<8x32xf32>
      %c0_25 = arith.constant 0 : index
      %c0_26 = arith.constant 0 : index
      %45 = vector.load %arg6[%c0_25, %c0_26] : memref<1x32xf32, #tpu.memory_space<vmem>>, vector<1x32xf32>
      %46 = vector.broadcast %45 : vector<1x32xf32> to vector<8x32xf32>
      %47 = arith.addf %44, %46 : vector<8x32xf32>
      %c0_27 = arith.constant 0 : index
      %c0_28 = arith.constant 0 : index
      %48 = vector.load %arg10[%c0_27, %c0_28] : memref<8x32xf32, #tpu.memory_space<vmem>>, vector<8x32xf32>
      tpu.vector_store %arg10[%c0_27, %c0_28], %47 {strides = array<i32>} : memref<8x32xf32, #tpu.memory_space<vmem>>, vector<8x32xf32>,
    } else {
    }
    %c0 = arith.constant 0 : index
    %c0_1 = arith.constant 0 : index
    %3 = vector.load %arg10[%c0, %c0_1] : memref<8x32xf32, #tpu.memory_space<vmem>>, vector<8x32xf32>
    %c0_2 = arith.constant 0 : index
    %c0_3 = arith.constant 0 : index
    %4 = vector.load %arg7[%c0_2, %c0_3] : memref<32x128xf32, #tpu.memory_space<vmem>>, vector<32x128xf32>
    %cst = arith.constant dense<0.000000e+00> : vector<8x128xf32>
    %5 = tpu.matmul %3, %4, %cst {dimension_numbers = #tpu.dot_dimension_numbers<[1], [0], [0], [1], [0, 0, 1, 1], [], []>} : vector<8x32xf32>, vector<32x128xf32>, vector<8x128xf32> -> vector<8x128xf32>
    %c0_4 = arith.constant 0 : index
    %c0_5 = arith.constant 0 : index
    %6 = vector.load %arg8[%c0_4, %c0_5] : memref<1x128xf32, #tpu.memory_space<vmem>>, vector<1x128xf32>
    %7 = vector.broadcast %6 : vector<1x128xf32> to vector<8x128xf32>
    %8 = arith.addf %5, %7 : vector<8x128xf32>
    %c0_6 = arith.constant 0 : index
    %c0_7 = arith.constant 0 : index
    %9 = vector.load %arg9[%c0_6, %c0_7] : memref<8x128xf32, #tpu.memory_space<vmem>>, vector<8x128xf32>
    tpu.vector_store %arg9[%c0_6, %c0_7], %8 {strides = array<i32>} : memref<8x128xf32, #tpu.memory_space<vmem>>, vector<8x128xf32>,
    return
  }
  func.func @transform_0(%arg0: i32, %arg1: i32) -> (i32, i32) {
    %c0_i32 = arith.constant 0 : i32
    %c0_i32_0 = arith.constant 0 : i32
    return %arg0, %c0_i32 : i32, i32
  }
  func.func @transform_1(%arg0: i32, %arg1: i32) -> (i32, i32) {
    %c0_i32 = arith.constant 0 : i32
    %c0_i32_0 = arith.constant 0 : i32
    %c0_i32_1 = arith.constant 0 : i32
    return %c0_i32, %c0_i32_0 : i32, i32
  }
  func.func @transform_2(%arg0: i32, %arg1: i32) -> (i32, i32) {
    %c0_i32 = arith.constant 0 : i32
    %c0_i32_0 = arith.constant 0 : i32
    %c0_i32_1 = arith.constant 0 : i32
    return %c0_i32, %c0_i32_0 : i32, i32
  }
  func.func @transform_3(%arg0: i32, %arg1: i32) -> (i32, i32) {
    %c0_i32 = arith.constant 0 : i32
    %c0_i32_0 = arith.constant 0 : i32
    %c0_i32_1 = arith.constant 0 : i32
    return %c0_i32, %c0_i32_0 : i32, i32
  }
  func.func @transform_4(%arg0: i32, %arg1: i32) -> (i32, i32) {
    %c0_i32 = arith.constant 0 : i32
    %c0_i32_0 = arith.constant 0 : i32
    %c0_i32_1 = arith.constant 0 : i32
    return %c0_i32, %c0_i32_0 : i32, i32
  }
  func.func @transform_5(%arg0: i32, %arg1: i32) -> (i32, i32) {
    %c0_i32 = arith.constant 0 : i32
    %c0_i32_0 = arith.constant 0 : i32
    return %c0_i32, %arg1 : i32, i32
  }
  func.func @transform_6(%arg0: i32, %arg1: i32) -> (i32, i32) {
    %c0_i32 = arith.constant 0 : i32
    %c0_i32_0 = arith.constant 0 : i32
    return %c0_i32, %arg1 : i32, i32
  }
  func.func @transform_7(%arg0: i32, %arg1: i32) -> (i32, i32) {
    %c0_i32 = arith.constant 0 : i32
    return %arg0, %arg1 : i32, i32
  }
}

</mosaic_0001>

<bundles_post_ra>
// kernel: tpu_custom_call.1
= control target key start
LH: loop header
LB: loop body
LE: loop exit
PB: predicated region body
PF: predicated region fallthrough
CT: control target
= control target key end

     0   :  { %12 = vsyncpa [#allocation4], 0  ;;  %s443_s0 = inlined_call_operand.hbm [shape: f32[8,32], index: 0, kind: input, shape index: {}]   ;;  %s444_s1 = inlined_call_operand.hbm [shape: f32[32,32], index: 1, kind: input, shape index: {}]   ;;  %s445_s2 = inlined_call_operand.vmem [shape: f32[1,32], index: 2, kind: input, shape index: {}]   ;;  %s446_s3 = inlined_call_operand.vmem [shape: f32[1,32], index: 3, kind: input, shape index: {}]   ;;  %s447_s4 = inlined_call_operand.vmem [shape: f32[1,32], index: 4, kind: input, shape index: {}]   ;;  %s448_s5 = inlined_call_operand.hbm [shape: f32[32,128], index: 5, kind: input, shape index: {}]   ;;  %s449_s6 = inlined_call_operand.vmem [shape: f32[1,128], index: 6, kind: input, shape index: {}]   ;;  %s450_s7 = inlined_call_operand.hbm [shape: f32[8,128], index: 7, kind: output, shape index: {}]  }
   0x1   :  { %13 = vsyncpa [#allocation7], 0  ;;  %s30_s26 = sshll.u32 %s444_s1, 4  ;;  %s31_s26 = int_to_ptr.hbm [resolvable:$true] %s30_s26 }
   0x2   :  { %14 = vsyncpa [#allocation5], 0  ;;  %s367_s27 = smov [#allocation6]   ;;  %s20_s8 = sshll.u32 %s443_s0, 4  ;;  %s21_s8 = int_to_ptr.hbm [resolvable:$true] %s20_s8 }
   0x3   :  { %s32_s28 = sshll.u32 %s367_s27, 4  ;;  %s368_s9 = smov 128   ;;  %s33_s28 = int_to_ptr.vmem [resolvable:$true] %s32_s28 }
   0x4   :  { %s369_s10 = smov 8   ;;  %s370_s11 = smov [#allocation3]  }
   0x5   :  { %38 = dma.hbm_to_vmem [thread:$0]  %s31_s26, 512, %s33_s28, [#allocation7], %s368_s9, %s368_s9, %s369_s10  }
   0x6   :  { %s22_s12 = sshll.u32 %s370_s11, 4  ;;  %s49_s15 = sshll.u32 %s448_s5, 4  ;;  %s23_s12 = int_to_ptr.vmem [resolvable:$true] %s22_s12  ;;  %s50_s15 = int_to_ptr.hbm [resolvable:$true] %s49_s15 }
   0x7   :  { %25 = dma.hbm_to_vmem [thread:$0]  %s21_s8, 128, %s23_s12, [#allocation4]  }
   0x8   :  { %s371_s1 = smov [#allocation8]  }
   0x9   :  { %s51_s16 = sshll.u32 %s371_s1, 4  ;;  %s52_s16 = int_to_ptr.vmem [resolvable:$true] %s51_s16 }
   0xa   :  { %57 = dma.hbm_to_vmem [thread:$0]  %s50_s15, 512, %s52_s16, [#allocation7], %s368_s9, %s368_s9, %s369_s10  }
   0xb   :  { %361 = dma.done.wait [#allocation4], 128  }
   0xc   :  { %362 = vsyncadd [#allocation4], 4294967168 }
   0xd   :  { %363 = dma.done.wait [#allocation7], 1024  }
   0xe   :  { %364 = vsyncadd [#allocation7], 4294966272  ;;  %v80_v0 = vld [vmem:[#allocation6 + $0x18] sm:$0xff]  ;;  %v79_v1 = vld [vmem:[#allocation6 + $0x10] sm:$0xff]  ;;  %vm85_vm0 = vcmask 261120   ;;  %v372_v48 = vmov 32.0  }
   0xf   :  { %101 = vmatpush.msra.mxu0 %v80_v0  ;;  %v78_v2 = vld [vmem:[#allocation6 + $0x8] sm:$0xff]  ;;  %v77_v3 = vld [vmem:[#allocation6] sm:$0xff]  ;;  %v76_v4 = vld [vmem:[#allocation3] sm:$0xff]  ;;  %s373_s22 = smov [#allocation9]   ;;  %s234_s25 = sshll.u32 %s450_s7, 4  ;;  %s235_s25 = int_to_ptr.hbm [resolvable:$true] %s234_s25 }
  0x10   :  { %v255_v5 = vld [vmem:[%s445_s2] ss:$0 sm:$0xff]  ;;  %v197_v60 = vld [vmem:[#allocation8 + $0x18] sm:$0xff]  ;;  %v195_v62 = vld [vmem:[#allocation8 + $0x8] sm:$0xff] }
  0x11   :  { %102 = vmatpush.msra.mxu0 %v79_v1  ;;  %v196_v61 = vld [vmem:[#allocation8 + $0x10] sm:$0xff]  ;;  %218 = vmatpush.msra.mxu1 %v197_v60  ;;  %v194_v1 = vld [vmem:[#allocation8] sm:$0xff] }
  0x13   :  { %103 = vmatpush.msra.mxu0 %v78_v2  ;;  %219 = vmatpush.msra.mxu1 %v196_v61 }
  0x15   :  { %104 = vmatpush.msra.mxu0 %v77_v3  ;;  %220 = vmatpush.msra.mxu1 %v195_v62 }
  0x16   :  { %245 = vmatmul.msk.f32.vlgmr.msra.gmra.mxu0 %vm85_vm0, %v76_v4 }
  0x17   :  { %221 = vmatpush.msra.mxu1 %v194_v1 }
  0x93   :  { %v106_v6 = vpop.f32.mrf.mxu0 }
  0x94   :  { %v107_v7 = vadd.f32 %v255_v5, %v106_v6 }
  0x96   :  { %v110_v8 = vmul.f32 0.70710677, %v107_v7  ;;  %v109_v44 = vmul.f32 0.5, %v107_v7 }
  0x98   :  { %v111_v9 = vmul.f32 %v110_v8, %v110_v8 }
  0x9a   :  { %v112_v10 = vmin.f32 %v111_v9, 16.0  ;;  %v256_v9 = vld [vmem:[%s446_s3] ss:$0 sm:$0xff]  ;;  %s232_s3 = sshll.u32 %s373_s22, 4  ;;  %s233_s3 = int_to_ptr.vmem [resolvable:$true] %s232_s3 }
  0x9c   :  { %v113_v11 = vmul.f32 2.1237322e-06, %v112_v10  ;;  %v124_v12 = vmul.f32 3.8918573e-05, %v112_v10 }
  0x9e   :  { %v114_v13 = vadd.f32 0.00028619796, %v113_v11  ;;  %v125_v14 = vadd.f32 0.001143296, %v124_v12  ;;  %v257_v11 = vld [vmem:[%s447_s4] ss:$0 sm:$0xff] }
  0xa0   :  { %v115_v15 = vmul.f32 %v114_v13, %v112_v10  ;;  %v126_v16 = vmul.f32 %v125_v14, %v112_v10 }
  0xa2   :  { %v127_v17 = vadd.f32 0.014752088, %v126_v16  ;;  %v116_v18 = vadd.f32 0.0036580483, %v115_v15  ;;  %v258_v16 = vld [vmem:[%s449_s6] ss:$0 sm:$0xff] }
  0xa4   :  { %v128_v19 = vmul.f32 %v127_v17, %v112_v10  ;;  %v117_v21 = vmul.f32 %v116_v18, %v112_v10 }
  0xa6   :  { %v129_v20 = vadd.f32 0.112945676, %v128_v19  ;;  %v118_v24 = vadd.f32 0.05243302, %v117_v21 }
  0xa8   :  { %v130_v22 = vmul.f32 %v129_v20, %v112_v10  ;;  %v119_v27 = vmul.f32 %v118_v24, %v112_v10 }
  0xaa   :  { %v131_v23 = vadd.f32 0.4994258, %v130_v22  ;;  %v120_v28 = vadd.f32 0.18741608, %v119_v27 }
  0xac   :  { %v132_v25 = vmul.f32 %v131_v23, %v112_v10  ;;  %v121_v30 = vmul.f32 %v120_v28, %v112_v10 }
  0xae   :  { %v133_v26 = vadd.f32 1.0, %v132_v25  ;;  %v122_v34 = vadd.f32 1.1283791, %v121_v30 }
  0xb0   :  { %259 = vrcp.f32 %v133_v26  ;;  %v145_v33 = vand.u32 2147483648, %v133_v26  ;;  %v143_v36 = vand.u32 2147483647, %v133_v26  ;;  %vm139_vm2 = vweird.f32 %v133_v26 }
  0xb1   :  { %v123_v39 = vmul.f32 %v122_v34, %v110_v8  ;;  %261 = vrcp.f32 %v372_v48 }
  0xb2   :  { %v146_v38 = vor.u32 1.1754944e-38, %v145_v33  ;;  %vm144_vm4 = vcmp.eq.f32.partialorder %v143_v36, 8.507059e+37 }
  0xb6   :  { %v260_v29 = vpop.eup %259 }
  0xb7   :  { %v135_v31 = vmul.f32 %v260_v29, %v133_v26  ;;  %vm140_vm1 = vweird.f32 %v260_v29  ;;  %v262_v49 = vpop.eup %261 }
  0xb8   :  { %vm141_vm3 = vmor %vm139_vm2, %vm140_vm1  ;;  %v157_v50 = vmul.f32 32.0, %v262_v49  ;;  %vm161_vm5 = vweird.f32 %v262_v49 }
  0xb9   :  { %v136_v32 = vsub.f32 1.0, %v135_v31 }
  0xba   :  { %v158_v51 = vsub.f32 1.0, %v157_v50 }
  0xbb   :  { %v137_v35 = vmul.f32 %v260_v29, %v136_v32 }
  0xbc   :  { %v159_v52 = vmul.f32 %v262_v49, %v158_v51 }
  0xbd   :  { %v138_v37 = vadd.f32 %v260_v29, %v137_v35 }
  0xbe   :  { %v160_v53 = vadd.f32 %v262_v49, %v159_v52 }
  0xbf   :  { %v142_v40 = vsel %vm141_vm3, %v260_v29, %v138_v37 }
  0xc0   :  { %v147_v41 = vsel %vm144_vm4, %v146_v38, %v142_v40  ;;  %v162_v54 = vsel %vm161_vm5, %v262_v49, %v160_v53 }
  0xc1   :  { %v148_v42 = vmul.f32 %v147_v41, %v123_v39 }
  0xc3   :  { %v246_v43 = vclamps-f32 %v148_v42, 1.0 }
  0xc5   :  { %v151_v45 = vadd.f32 1.0, %v246_v43 }
  0xc7   :  { %v152_v46 = vmul.f32 %v151_v45, %v109_v44 }
  0xc9   :  { %v153_v47 = vsel %vm85_vm0, %v152_v46, 0.0 }
  0xca   :  { %154 = vadd.xlane.f32.xlu0 %v153_v47 }
 0x13d   :  { %v155_v55 = vpop.xlane.xlu0 %154 }
 0x13e   :  { %v163_v56 = vmul.f32 %v162_v54, %v155_v55 }
 0x140   :  { %v164_v57 = vsub.f32 %v152_v46, %v163_v56 }
 0x142   :  { %v165_v58 = vmul.f32 %v164_v57, %v164_v57 }
 0x144   :  { %v166_v59 = vsel %vm85_vm0, %v165_v58, 0.0 }
 0x145   :  { %167 = vadd.xlane.f32.xlu0 %v166_v59 }
 0x1b8   :  { %v168_v63 = vpop.xlane.xlu0 %167 }
 0x1b9   :  { %v169_v0 = vmul.f32 %v168_v63, %v162_v54 }
 0x1bb   :  { %v170_v2 = vadd.f32 1e-12, %v169_v0 }
 0x1bd   :  { %263 = vrsqrt.f32 %v170_v2  ;;  %vm177_vm7 = vweird.f32 %v170_v2 }
 0x1c3   :  { %v264_v3 = vpop.eup %263 }
 0x1c4   :  { %v172_v4 = vmul.f32 %v264_v3, %v170_v2  ;;  %vm178_vm6 = vweird.f32 %v264_v3 }
 0x1c5   :  { %vm179_vm8 = vmor %vm177_vm7, %vm178_vm6 }
 0x1c6   :  { %v173_v5 = vmul.f32 %v264_v3, %v172_v4 }
 0x1c8   :  { %v174_v6 = vmul.f32 0.5, %v173_v5 }
 0x1ca   :  { %v175_v7 = vsub.f32 1.5, %v174_v6 }
 0x1cc   :  { %v176_v8 = vmul.f32 %v264_v3, %v175_v7 }
 0x1ce   :  { %v180_v10 = vsel %vm179_vm8, %v264_v3, %v176_v8 }
 0x1cf   :  { %v181_v12 = vmul.f32 %v180_v10, %v164_v57 }
 0x1d1   :  { %v186_v13 = vmul.f32 %v256_v9, %v181_v12 }
 0x1d3   :  { %v191_v14 = vadd.f32 %v257_v11, %v186_v13 }
 0x1d5   :  { %192 = vst.msk [vmem:[#allocation2] sm:$0xff] %vm85_vm0, %v191_v14 }
 0x1dc   :  { %v193_v15 = vld [vmem:[#allocation2] sm:$0xff] }
 0x1dd   :  { %247 = vmatmul.msk.f32.vlgmr.msra.gmra.mxu1 %vm85_vm0, %v193_v15 }
 0x25a   :  { %v223_v17 = vpop.f32.mrf.mxu1 }
 0x25b   :  { %v224_v18 = vadd.f32 %v258_v16, %v223_v17 }
 0x25d   :  { %226 = vst [vmem:[#allocation9] sm:$0xff] %v224_v18 }
 0x25e   :  { %237 = dma.vmem_to_hbm [thread:$0]  %s233_s3, 128, %s235_s25, [#allocation5]  }
 0x25f   :  { %365 = dma.done.wait [#allocation5], 128  }
 0x260   :  { %366 = vsyncadd [#allocation5], 4294967168 }
 0x261   :  { %242 = vsyncpa [#allocation4], 1 }
 0x262   :  { %243 = vsyncpa [#allocation7], 1 }
 0x263   :  { %244 = vsyncpa [#allocation5], 1 }

// kernel: tpu_custom_call.1
= control target key start
LH: loop header
LB: loop body
LE: loop exit
PB: predicated region body
PF: predicated region fallthrough
CT: control target
= control target key end

     0   :  { %12 = vsyncpa [#allocation4], 0  ;;  %s443_s0 = inlined_call_operand.hbm [shape: f32[8,32], index: 0, kind: input, shape index: {}]   ;;  %s444_s1 = inlined_call_operand.hbm [shape: f32[32,32], index: 1, kind: input, shape index: {}]   ;;  %s445_s2 = inlined_call_operand.vmem [shape: f32[1,32], index: 2, kind: input, shape index: {}]   ;;  %s446_s3 = inlined_call_operand.vmem [shape: f32[1,32], index: 3, kind: input, shape index: {}]   ;;  %s447_s4 = inlined_call_operand.vmem [shape: f32[1,32], index: 4, kind: input, shape index: {}]   ;;  %s448_s5 = inlined_call_operand.hbm [shape: f32[32,128], index: 5, kind: input, shape index: {}]   ;;  %s449_s6 = inlined_call_operand.vmem [shape: f32[1,128], index: 6, kind: input, shape index: {}]   ;;  %s450_s7 = inlined_call_operand.hbm [shape: f32[8,128], index: 7, kind: output, shape index: {}]  }
   0x1   :  { %13 = vsyncpa [#allocation7], 0  ;;  %s30_s26 = sshll.u32 %s444_s1, 4  ;;  %s31_s26 = int_to_ptr.hbm [resolvable:$true] %s30_s26 }
   0x2   :  { %14 = vsyncpa [#allocation5], 0  ;;  %s367_s27 = smov [#allocation6]   ;;  %s20_s8 = sshll.u32 %s443_s0, 4  ;;  %s21_s8 = int_to_ptr.hbm [resolvable:$true] %s20_s8 }
   0x3   :  { %s32_s28 = sshll.u32 %s367_s27, 4  ;;  %s368_s9 = smov 128   ;;  %s33_s28 = int_to_ptr.vmem [resolvable:$true] %s32_s28 }
   0x4   :  { %s369_s10 = smov 8   ;;  %s370_s11 = smov [#allocation3]  }
   0x5   :  { %38 = dma.hbm_to_vmem [thread:$0]  %s31_s26, 512, %s33_s28, [#allocation7], %s368_s9, %s368_s9, %s369_s10  }
   0x6   :  { %s22_s12 = sshll.u32 %s370_s11, 4  ;;  %s49_s15 = sshll.u32 %s448_s5, 4  ;;  %s23_s12 = int_to_ptr.vmem [resolvable:$true] %s22_s12  ;;  %s50_s15 = int_to_ptr.hbm [resolvable:$true] %s49_s15 }
   0x7   :  { %25 = dma.hbm_to_vmem [thread:$0]  %s21_s8, 128, %s23_s12, [#allocation4]  }
   0x8   :  { %s371_s1 = smov [#allocation8]  }
   0x9   :  { %s51_s16 = sshll.u32 %s371_s1, 4  ;;  %s52_s16 = int_to_ptr.vmem [resolvable:$true] %s51_s16 }
   0xa   :  { %57 = dma.hbm_to_vmem [thread:$0]  %s50_s15, 512, %s52_s16, [#allocation7], %s368_s9, %s368_s9, %s369_s10  }
   0xb   :  { %361 = dma.done.wait [#allocation4], 128  }
   0xc   :  { %362 = vsyncadd [#allocation4], 4294967168 }
   0xd   :  { %363 = dma.done.wait [#allocation7], 1024  }
   0xe   :  { %364 = vsyncadd [#allocation7], 4294966272  ;;  %v80_v0 = vld [vmem:[#allocation6 + $0x18] sm:$0xff]  ;;  %v79_v1 = vld [vmem:[#allocation6 + $0x10] sm:$0xff]  ;;  %vm85_vm0 = vcmask 261120   ;;  %v372_v48 = vmov 32.0  }
   0xf   :  { %101 = vmatpush.msra.mxu0 %v80_v0  ;;  %v78_v2 = vld [vmem:[#allocation6 + $0x8] sm:$0xff]  ;;  %v77_v3 = vld [vmem:[#allocation6] sm:$0xff]  ;;  %v76_v4 = vld [vmem:[#allocation3] sm:$0xff]  ;;  %s373_s22 = smov [#allocation9]   ;;  %s234_s25 = sshll.u32 %s450_s7, 4  ;;  %s235_s25 = int_to_ptr.hbm [resolvable:$true] %s234_s25 }
  0x10   :  { %v255_v5 = vld [vmem:[%s445_s2] ss:$0 sm:$0xff]  ;;  %v197_v60 = vld [vmem:[#allocation8 + $0x18] sm:$0xff]  ;;  %v195_v62 = vld [vmem:[#allocation8 + $0x8] sm:$0xff] }
  0x11   :  { %102 = vmatpush.msra.mxu0 %v79_v1  ;;  %v196_v61 = vld [vmem:[#allocation8 + $0x10] sm:$0xff]  ;;  %218 = vmatpush.msra.mxu1 %v197_v60  ;;  %v194_v1 = vld [vmem:[#allocation8] sm:$0xff] }
  0x13   :  { %103 = vmatpush.msra.mxu0 %v78_v2  ;;  %219 = vmatpush.msra.mxu1 %v196_v61 }
  0x15   :  { %104 = vmatpush.msra.mxu0 %v77_v3  ;;  %220 = vmatpush.msra.mxu1 %v195_v62 }
  0x16   :  { %245 = vmatmul.msk.f32.vlgmr.msra.gmra.mxu0 %vm85_vm0, %v76_v4 }
  0x17   :  { %221 = vmatpush.msra.mxu1 %v194_v1 }
  0x93   :  { %v106_v6 = vpop.f32.mrf.mxu0 }
  0x94   :  { %v107_v7 = vadd.f32 %v255_v5, %v106_v6 }
  0x96   :  { %v110_v8 = vmul.f32 0.70710677, %v107_v7  ;;  %v109_v44 = vmul.f32 0.5, %v107_v7 }
  0x98   :  { %v111_v9 = vmul.f32 %v110_v8, %v110_v8 }
  0x9a   :  { %v112_v10 = vmin.f32 %v111_v9, 16.0  ;;  %v256_v9 = vld [vmem:[%s446_s3] ss:$0 sm:$0xff]  ;;  %s232_s3 = sshll.u32 %s373_s22, 4  ;;  %s233_s3 = int_to_ptr.vmem [resolvable:$true] %s232_s3 }
  0x9c   :  { %v113_v11 = vmul.f32 2.1237322e-06, %v112_v10  ;;  %v124_v12 = vmul.f32 3.8918573e-05, %v112_v10 }
  0x9e   :  { %v114_v13 = vadd.f32 0.00028619796, %v113_v11  ;;  %v125_v14 = vadd.f32 0.001143296, %v124_v12  ;;  %v257_v11 = vld [vmem:[%s447_s4] ss:$0 sm:$0xff] }
  0xa0   :  { %v115_v15 = vmul.f32 %v114_v13, %v112_v10  ;;  %v126_v16 = vmul.f32 %v125_v14, %v112_v10 }
  0xa2   :  { %v127_v17 = vadd.f32 0.014752088, %v126_v16  ;;  %v116_v18 = vadd.f32 0.0036580483, %v115_v15  ;;  %v258_v16 = vld [vmem:[%s449_s6] ss:$0 sm:$0xff] }
  0xa4   :  { %v128_v19 = vmul.f32 %v127_v17, %v112_v10  ;;  %v117_v21 = vmul.f32 %v116_v18, %v112_v10 }
  0xa6   :  { %v129_v20 = vadd.f32 0.112945676, %v128_v19  ;;  %v118_v24 = vadd.f32 0.05243302, %v117_v21 }
  0xa8   :  { %v130_v22 = vmul.f32 %v129_v20, %v112_v10  ;;  %v119_v27 = vmul.f32 %v118_v24, %v112_v10 }
  0xaa   :  { %v131_v23 = vadd.f32 0.4994258, %v130_v22  ;;  %v120_v28 = vadd.f32 0.18741608, %v119_v27 }
  0xac   :  { %v132_v25 = vmul.f32 %v131_v23, %v112_v10  ;;  %v121_v30 = vmul.f32 %v120_v28, %v112_v10 }
  0xae   :  { %v133_v26 = vadd.f32 1.0, %v132_v25  ;;  %v122_v34 = vadd.f32 1.1283791, %v121_v30 }
  0xb0   :  { %259 = vrcp.f32 %v133_v26  ;;  %v145_v33 = vand.u32 2147483648, %v133_v26  ;;  %v143_v36 = vand.u32 2147483647, %v133_v26  ;;  %vm139_vm2 = vweird.f32 %v133_v26 }
  0xb1   :  { %v123_v39 = vmul.f32 %v122_v34, %v110_v8  ;;  %261 = vrcp.f32 %v372_v48 }
  0xb2   :  { %v146_v38 = vor.u32 1.1754944e-38, %v145_v33  ;;  %vm144_vm4 = vcmp.eq.f32.partialorder %v143_v36, 8.507059e+37 }
  0xb6   :  { %v260_v29 = vpop.eup %259 }
  0xb7   :  { %v135_v31 = vmul.f32 %v260_v29, %v133_v26  ;;  %vm140_vm1 = vweird.f32 %v260_v29  ;;  %v262_v49 = vpop.eup %261 }
  0xb8   :  { %vm141_vm3 = vmor %vm139_vm2, %vm140_vm1  ;;  %v157_v50 = vmul.f32 32.0, %v262_v49  ;;  %vm161_vm5 = vweird.f32 %v262_v49 }
  0xb9   :  { %v136_v32 = vsub.f32 1.0, %v135_v31 }
  0xba   :  { %v158_v51 = vsub.f32 1.0, %v157_v50 }
  0xbb   :  { %v137_v35 = vmul.f32 %v260_v29, %v136_v32 }
  0xbc   :  { %v159_v52 = vmul.f32 %v262_v49, %v158_v51 }
  0xbd   :  { %v138_v37 = vadd.f32 %v260_v29, %v137_v35 }
  0xbe   :  { %v160_v53 = vadd.f32 %v262_v49, %v159_v52 }
  0xbf   :  { %v142_v40 = vsel %vm141_vm3, %v260_v29, %v138_v37 }
  0xc0   :  { %v147_v41 = vsel %vm144_vm4, %v146_v38, %v142_v40  ;;  %v162_v54 = vsel %vm161_vm5, %v262_v49, %v160_v53 }
  0xc1   :  { %v148_v42 = vmul.f32 %v147_v41, %v123_v39 }
  0xc3   :  { %v246_v43 = vclamps-f32 %v148_v42, 1.0 }
  0xc5   :  { %v151_v45 = vadd.f32 1.0, %v246_v43 }
  0xc7   :  { %v152_v46 = vmul.f32 %v151_v45, %v109_v44 }
  0xc9   :  { %v153_v47 = vsel %vm85_vm0, %v152_v46, 0.0 }
  0xca   :  { %154 = vadd.xlane.f32.xlu0 %v153_v47 }
 0x13d   :  { %v155_v55 = vpop.xlane.xlu0 %154 }
 0x13e   :  { %v163_v56 = vmul.f32 %v162_v54, %v155_v55 }
 0x140   :  { %v164_v57 = vsub.f32 %v152_v46, %v163_v56 }
 0x142   :  { %v165_v58 = vmul.f32 %v164_v57, %v164_v57 }
 0x144   :  { %v166_v59 = vsel %vm85_vm0, %v165_v58, 0.0 }
 0x145   :  { %167 = vadd.xlane.f32.xlu0 %v166_v59 }
 0x1b8   :  { %v168_v63 = vpop.xlane.xlu0 %167 }
 0x1b9   :  { %v169_v0 = vmul.f32 %v168_v63, %v162_v54 }
 0x1bb   :  { %v170_v2 = vadd.f32 1e-12, %v169_v0 }
 0x1bd   :  { %263 = vrsqrt.f32 %v170_v2  ;;  %vm177_vm7 = vweird.f32 %v170_v2 }
 0x1c3   :  { %v264_v3 = vpop.eup %263 }
 0x1c4   :  { %v172_v4 = vmul.f32 %v264_v3, %v170_v2  ;;  %vm178_vm6 = vweird.f32 %v264_v3 }
 0x1c5   :  { %vm179_vm8 = vmor %vm177_vm7, %vm178_vm6 }
 0x1c6   :  { %v173_v5 = vmul.f32 %v264_v3, %v172_v4 }
 0x1c8   :  { %v174_v6 = vmul.f32 0.5, %v173_v5 }
 0x1ca   :  { %v175_v7 = vsub.f32 1.5, %v174_v6 }
 0x1cc   :  { %v176_v8 = vmul.f32 %v264_v3, %v175_v7 }
 0x1ce   :  { %v180_v10 = vsel %vm179_vm8, %v264_v3, %v176_v8 }
 0x1cf   :  { %v181_v12 = vmul.f32 %v180_v10, %v164_v57 }
 0x1d1   :  { %v186_v13 = vmul.f32 %v256_v9, %v181_v12 }
 0x1d3   :  { %v191_v14 = vadd.f32 %v257_v11, %v186_v13 }
 0x1d5   :  { %192 = vst.msk [vmem:[#allocation2] sm:$0xff] %vm85_vm0, %v191_v14 }
 0x1dc   :  { %v193_v15 = vld [vmem:[#allocation2] sm:$0xff] }
 0x1dd   :  { %247 = vmatmul.msk.f32.vlgmr.msra.gmra.mxu1 %vm85_vm0, %v193_v15 }
 0x25a   :  { %v223_v17 = vpop.f32.mrf.mxu1 }
 0x25b   :  { %v224_v18 = vadd.f32 %v258_v16, %v223_v17 }
 0x25d   :  { %226 = vst [vmem:[#allocation9] sm:$0xff] %v224_v18 }
 0x25e   :  { %237 = dma.vmem_to_hbm [thread:$0]  %s233_s3, 128, %s235_s25, [#allocation5]  }
 0x25f   :  { %365 = dma.done.wait [#allocation5], 128  }
 0x260   :  { %366 = vsyncadd [#allocation5], 4294967168 }
 0x261   :  { %242 = vsyncpa [#allocation4], 1 }
 0x262   :  { %243 = vsyncpa [#allocation7], 1 }
 0x263   :  { %244 = vsyncpa [#allocation5], 1 }

</bundles_post_ra>
